<compile_context>
chip_gen: v6e
topology: v6e:2x2x1
jax: 0.10.0
libtpu: 0.0.40
codegen_flags: <defaults>
</compile_context>

<pallas_src>
import functools

import jax
import jax.numpy as jnp
from jax.experimental import pallas as pl
from jax.experimental.pallas import tpu as pltpu


def _round_up(x, m):
    return (x + m - 1) // m * m


def critic_kernel(x_ref, w1_ref, b1_ref, w2_ref, b2_ref, o_ref):
    # x_ref : (n_states, TB)   batch on lanes
    # w1_ref: (n_middle, n_states)
    # b1_ref: (n_middle, 1)
    # w2_ref: (n_middle, 1)
    # b2_ref: (1,) in SMEM (scalar)
    # o_ref : (1, TB)          lane-dense output slab
    x = x_ref[...]
    w1 = w1_ref[...]
    # fc1 on the MXU: (30,3) @ (3,TB) -> (30,TB), f32 accumulation.
    h = jnp.dot(w1, x, preferred_element_type=jnp.float32)
    h = jnp.maximum(h + b1_ref[...], 0.0)                       # bias + ReLU (VPU)
    # fc2 (N=1): VPU multiply + cross-sublane (XLU) reduce instead of an MXU pass.
    out = jnp.sum(h * w2_ref[...], axis=0, keepdims=True)       # (1, TB)
    o_ref[...] = out + b2_ref[0]


@functools.partial(jax.jit, static_argnames=("block_b",))
def critic_forward(x, w1, b1, w2, b2, *, block_b=1024):
    """x: (B, n_states); w1: (n_middle, n_states); b1: (n_middle,);
    w2: (1, n_middle); b2: (1,). Returns (B, 1) float32."""
    B, n_states = x.shape
    n_middle = w1.shape[0]

    # Batch tile: multiple of 128 lanes; bounded so (2x double-buffered x-tile +
    # output tile + resident weights) stays far under VMEM even on v7x (64 MiB).
    block_b = _round_up(block_b, 128)
    tb = min(block_b, _round_up(B, 128))
    b_pad = _round_up(B, tb)

    # Lane-dense re-layout (wrapper-side glue, no in-kernel transpose).
    xT = x.astype(jnp.float32).T                                 # (n_states, B)
    if b_pad > B:
        xT = jnp.pad(xT, ((0, 0), (0, b_pad - B)))
    w1f = w1.astype(jnp.float32)                                 # (n_middle, n_states)
    b1_col = b1.reshape(n_middle, 1).astype(jnp.float32)         # (n_middle, 1)
    w2_col = w2.reshape(n_middle, 1).astype(jnp.float32)         # (n_middle, 1)
    b2_s = b2.reshape(1).astype(jnp.float32)                     # (1,) -> SMEM scalar

    flops = 2 * B * n_states * n_middle + 2 * B * n_middle
    bytes_accessed = 4 * (B * n_states + B
                          + n_middle * n_states + 2 * n_middle + 1)

    out_slab = pl.pallas_call(
        critic_kernel,
        out_shape=jax.ShapeDtypeStruct((1, b_pad), jnp.float32),
        grid=(b_pad // tb,),
        in_specs=[
            pl.BlockSpec((n_states, tb), lambda i: (0, i)),       # x tile (pipelined)
            pl.BlockSpec((n_middle, n_states), lambda i: (0, 0)), # W1 resident
            pl.BlockSpec((n_middle, 1), lambda i: (0, 0)),        # b1 resident
            pl.BlockSpec((n_middle, 1), lambda i: (0, 0)),        # w2 resident
            pl.BlockSpec(memory_space=pltpu.MemorySpace.SMEM),    # b2 scalar
        ],
        out_specs=pl.BlockSpec((1, tb), lambda i: (0, i)),        # lane-dense store
        compiler_params=pltpu.CompilerParams(
            dimension_semantics=("parallel",)),
        cost_estimate=pl.CostEstimate(
            flops=flops, bytes_accessed=bytes_accessed, transcendentals=0),
    )(xT, w1f, b1_col, w2_col, b2_s)

    # (1, B_pad) -> (B, 1)
    return out_slab[0, :B].reshape(B, 1)


def init_params(key, n_states, n_middle=30):
    """Matches the PyTorch module's __init__: weights ~ N(0, 0.1);
    biases keep nn.Linear default U(-1/sqrt(fan_in), +1/sqrt(fan_in))."""
    k1, k2, k3, k4 = jax.random.split(key, 4)
    w1 = 0.1 * jax.random.normal(k1, (n_middle, n_states), dtype=jnp.float32)
    bound1 = 1.0 / jnp.sqrt(jnp.float32(n_states))
    b1 = jax.random.uniform(k2, (n_middle,), minval=-bound1, maxval=bound1,
                            dtype=jnp.float32)
    w2 = 0.1 * jax.random.normal(k3, (1, n_middle), dtype=jnp.float32)
    bound2 = 1.0 / jnp.sqrt(jnp.float32(n_middle))
    b2 = jax.random.uniform(k4, (1,), minval=-bound2, maxval=bound2,
                            dtype=jnp.float32)
    return w1, b1, w2, b2


if __name__ == "__main__":
    key = jax.random.PRNGKey(0)
    k_x, k_p = jax.random.split(key)

    # Pendulum-v0 observation dim = 3; small batch for the synthetic test.
    B, n_states, n_middle = 8, 3, 30
    x = jax.random.normal(k_x, (B, n_states), dtype=jnp.float32)
    w1, b1, w2, b2 = init_params(k_p, n_states, n_middle)

    out = critic_forward(x, w1, b1, w2, b2)
    out = jax.block_until_ready(out)

    # Pure-JAX reference check of the fused kernel.
    ref = jnp.maximum(x @ w1.T + b1, 0.0) @ w2.T + b2
    assert out.shape == (B, 1)
    assert jnp.allclose(out, ref, atol=1e-5, rtol=1e-5)

    print("KERNEL_OK")
</pallas_src>

<mosaic_0001>
module attributes {stable_mosaic.version = 11 : i64} {
  func.func @critic_kernel(%arg0: i32, %arg1: memref<3x128xf32, #tpu.memory_space<vmem>>, %arg2: memref<30x3xf32, #tpu.memory_space<vmem>>, %arg3: memref<30x1xf32, #tpu.memory_space<vmem>>, %arg4: memref<30x1xf32, #tpu.memory_space<vmem>>, %arg5: memref<1xf32, #tpu.memory_space<smem>>, %arg6: memref<1x128xf32, #tpu.memory_space<vmem>>) attributes {dimension_semantics = [#tpu.dimension_semantics<parallel>], iteration_bounds = array<i64: 1>, scalar_prefetch = 0 : i64, scratch_operands = 0 : i64, tpu.core_type = #tpu.core_type<tc>, window_params = [{transform_indices = @transform_0, window_bounds = array<i64: 3, 128>}, {pipeline_mode = #tpu.pipeline_mode<synchronous>, transform_indices = @transform_1, window_bounds = array<i64: 30, 3>}, {pipeline_mode = #tpu.pipeline_mode<synchronous>, transform_indices = @transform_2, window_bounds = array<i64: 30, 1>}, {pipeline_mode = #tpu.pipeline_mode<synchronous>, transform_indices = @transform_3, window_bounds = array<i64: 30, 1>}, {transform_indices = @transform_4, window_bounds = array<i64: 1>}, {transform_indices = @transform_5, window_bounds = array<i64: 1, 128>}]} {
    %c0 = arith.constant 0 : index
    %c0_0 = arith.constant 0 : index
    %0 = vector.load %arg1[%c0, %c0_0] : memref<3x128xf32, #tpu.memory_space<vmem>>, vector<3x128xf32>
    %c0_1 = arith.constant 0 : index
    %c0_2 = arith.constant 0 : index
    %1 = vector.load %arg2[%c0_1, %c0_2] : memref<30x3xf32, #tpu.memory_space<vmem>>, vector<30x3xf32>
    %cst = arith.constant dense<0.000000e+00> : vector<30x128xf32>
    %2 = tpu.matmul %1, %0, %cst {dimension_numbers = #tpu.dot_dimension_numbers<[1], [0], [0], [1], [0, 0, 1, 1], [], []>} : vector<30x3xf32>, vector<3x128xf32>, vector<30x128xf32> -> vector<30x128xf32>
    %c0_3 = arith.constant 0 : index
    %c0_4 = arith.constant 0 : index
    %3 = vector.load %arg3[%c0_3, %c0_4] : memref<30x1xf32, #tpu.memory_space<vmem>>, vector<30x1xf32>
    %4 = vector.broadcast %3 : vector<30x1xf32> to vector<30x128xf32>
    %5 = arith.addf %2, %4 : vector<30x128xf32>
    %cst_5 = arith.constant 0.000000e+00 : f32
    %6 = vector.broadcast %cst_5 : f32 to vector<30x128xf32>
    %7 = arith.maximumf %5, %6 : vector<30x128xf32>
    %c0_6 = arith.constant 0 : index
    %c0_7 = arith.constant 0 : index
    %8 = vector.load %arg4[%c0_6, %c0_7] : memref<30x1xf32, #tpu.memory_space<vmem>>, vector<30x1xf32>
    %9 = vector.broadcast %8 : vector<30x1xf32> to vector<30x128xf32>
    %10 = arith.mulf %7, %9 : vector<30x128xf32>
    %cst_8 = arith.constant dense<0.000000e+00> : vector<128xf32>
    %11 = vector.multi_reduction <add>, %10, %cst_8 [0] : vector<30x128xf32> to vector<128xf32>
    %12 = vector.shape_cast %11 : vector<128xf32> to vector<1x128xf32>
    %c0_9 = arith.constant 0 : index
    %13 = memref.load %arg5[%c0_9] : memref<1xf32, #tpu.memory_space<smem>>
    %14 = vector.broadcast %13 : f32 to vector<1x128xf32>
    %15 = arith.addf %12, %14 : vector<1x128xf32>
    %c0_10 = arith.constant 0 : index
    %c0_11 = arith.constant 0 : index
    %16 = vector.load %arg6[%c0_10, %c0_11] : memref<1x128xf32, #tpu.memory_space<vmem>>, vector<1x128xf32>
    tpu.vector_store %arg6[%c0_10, %c0_11], %15 {strides = array<i32>} : memref<1x128xf32, #tpu.memory_space<vmem>>, vector<1x128xf32>,
    return
  }
  func.func @transform_0(%arg0: i32) -> (i32, i32) {
    %c0_i32 = arith.constant 0 : i32
    %c0_i32_0 = arith.constant 0 : i32
    return %c0_i32, %arg0 : i32, i32
  }
  func.func @transform_1(%arg0: i32) -> (i32, i32) {
    %c0_i32 = arith.constant 0 : i32
    %c0_i32_0 = arith.constant 0 : i32
    %c0_i32_1 = arith.constant 0 : i32
    return %c0_i32, %c0_i32_0 : i32, i32
  }
  func.func @transform_2(%arg0: i32) -> (i32, i32) {
    %c0_i32 = arith.constant 0 : i32
    %c0_i32_0 = arith.constant 0 : i32
    %c0_i32_1 = arith.constant 0 : i32
    return %c0_i32, %c0_i32_0 : i32, i32
  }
  func.func @transform_3(%arg0: i32) -> (i32, i32) {
    %c0_i32 = arith.constant 0 : i32
    %c0_i32_0 = arith.constant 0 : i32
    %c0_i32_1 = arith.constant 0 : i32
    return %c0_i32, %c0_i32_0 : i32, i32
  }
  func.func @transform_4(%arg0: i32) -> i32 {
    %c0_i32 = arith.constant 0 : i32
    %c0_i32_0 = arith.constant 0 : i32
    return %c0_i32 : i32
  }
  func.func @transform_5(%arg0: i32) -> (i32, i32) {
    %c0_i32 = arith.constant 0 : i32
    %c0_i32_0 = arith.constant 0 : i32
    return %c0_i32, %arg0 : i32, i32
  }
}

</mosaic_0001>

<bundles_post_ra>
// kernel: critic_forward.1
= control target key start
LH: loop header
LB: loop body
LE: loop exit
PB: predicated region body
PF: predicated region fallthrough
CT: control target
= control target key end

     0   :  { %vm63_vm0 = vcmask 1042432   ;;  %vm50_vm1 = vcmask 23552   ;;  %v226_v3 = vmov 0   ;;  %vm186_vm2 = vcmask 1045504   ;;  %s306_s0 = inlined_call_operand.vmem [shape: f32[3,128], index: 0, kind: input, shape index: {}]   ;;  %s307_s1 = inlined_call_operand.vmem [shape: f32[30,3], index: 1, kind: input, shape index: {}]   ;;  %s308_s2 = inlined_call_operand.vmem [shape: f32[30,1], index: 2, kind: input, shape index: {}]   ;;  %s309_s3 = inlined_call_operand.vmem [shape: f32[30,1], index: 3, kind: input, shape index: {}]   ;;  %s310_s4 = inlined_call_operand.<no memory space> [shape: f32[1], index: 4, kind: input, shape index: {}]   ;;  %s311_s5 = inlined_call_operand.vmem [shape: f32[1,128], index: 5, kind: output, shape index: {}]  }
   0x1   :  { %v21_v0 = vld [vmem:[%s306_s0] sm:$0x7]  ;;  %v24_v2 = vld [vmem:[%s307_s1 + $0x10] sm:$0xff]  ;;  %224 = vset.pattern.permute.xlu0 %v226_v3  ;;  %225 = vset.pattern.permute.xlu1 %v226_v3  ;;  %v23_v4 = vld [vmem:[%s307_s1 + $0x8] sm:$0xff]  ;;  %v196_v47 = vstv %s310_s4 }
   0x2   :  { %v22_v1 = vld [vmem:[%s307_s1] sm:$0xff]  ;;  %213 = vmatprep.subr.msk.mxu0 %vm63_vm0, %v21_v0  ;;  %221 = vmatprep.subr.msk.mxu1 %vm63_vm0, %v21_v0  ;;  %v25_v5 = vld [vmem:[%s307_s1 + $0x18] sm:$0x3f]  ;;  %v28_v7 = vld [vmem:[%s308_s2 + $0x10] sm:$0xff] }
   0x3   :  { %214 = vmatpush3.msk.msra.mxu0 %vm63_vm0, %v21_v0  ;;  %222 = vmatpush3.msk.msra.mxu1 %vm63_vm0, %v21_v0  ;;  %v26_v6 = vld [vmem:[%s308_s2] sm:$0xff]  ;;  %v27_v8 = vld [vmem:[%s308_s2 + $0x8] sm:$0xff]  ;;  %v29_v9 = vld [vmem:[%s308_s2 + $0x18] sm:$0x3f] }
   0x4   :  { %215 = vmatprep.mubr.msk.f32.mxu0 %vm50_vm1, %v22_v1  ;;  %218 = vmatprep.mubr.msk.f32.mxu1 %vm50_vm1, %v24_v2  ;;  %v156_v10 = vld [vmem:[%s309_s3] sm:$0xff]  ;;  %v157_v11 = vld [vmem:[%s309_s3 + $0x8] sm:$0xff]  ;;  %v158_v12 = vld [vmem:[%s309_s3 + $0x10] sm:$0xff] }
   0x5   :  { %216 = vmatmul.mubr.msk.f32.vlgmr.msra.gmra.mxu0 %vm50_vm1, %v23_v4  ;;  %219 = vmatmul.mubr.msk.f32.vlgmr.msra.gmra.mxu1 %vm50_vm1, %v25_v5  ;;  %v159_v13 = vld [vmem:[%s309_s3 + $0x18] sm:$0x3f] }
   0x6   :  { %32 = vperm.xlu0 %224, %v26_v6   ;;  %42 = vperm.xlu1 %225, %v28_v7  }
   0xa   :  { %37 = vperm.xlu0 %224, %v27_v8   ;;  %47 = vperm.xlu1 %225, %v29_v9  }
   0xe   :  { %162 = vperm.xlu0 %224, %v156_v10   ;;  %167 = vperm.xlu1 %225, %v157_v11  }
  0x12   :  { %172 = vperm.xlu0 %224, %v158_v12   ;;  %177 = vperm.xlu1 %225, %v159_v13  }
  0x81   :  { %v33_v14 = vpop.permute.xlu0 %32  ;;  %v43_v15 = vpop.permute.xlu1 %42 }
  0x85   :  { %v38_v16 = vpop.permute.xlu0 %37  ;;  %v48_v17 = vpop.permute.xlu1 %47 }
  0x89   :  { %v163_v20 = vpop.permute.xlu0 %162  ;;  %v168_v21 = vpop.permute.xlu1 %167 }
  0x8d   :  { %v178_v32 = vpop.permute.xlu1 %177  ;;  %v173_v35 = vpop.permute.xlu0 %172 }
  0xc5   :  { %v217_v18 = vpop.f32.mrf.mxu0  ;;  %v220_v19 = vpop.f32.mrf.mxu1 }
  0xc6   :  { %v139_v22 = vadd.f32 %v217_v18, %v38_v16  ;;  %v149_v23 = vadd.f32 %v220_v19, %v48_v17 }
  0xc7   :  { %v133_v24 = vpop.f32.mrf.mxu0  ;;  %v143_v25 = vpop.f32.mrf.mxu1 }
  0xc8   :  { %v153_v26 = vmax.f32 %v139_v22, 0.0  ;;  %v134_v27 = vadd.f32 %v133_v24, %v33_v14  ;;  %v144_v28 = vadd.f32 %v143_v25, %v43_v15  ;;  %v155_v29 = vmax.f32 %v149_v23, 0.0 }
  0xca   :  { %v152_v30 = vmax.f32 %v134_v27, 0.0  ;;  %v154_v31 = vmax.f32 %v144_v28, 0.0  ;;  %v181_v33 = vmul.f32 %v168_v21, %v153_v26  ;;  %v183_v36 = vmul.f32 %v178_v32, %v155_v29 }
  0xcc   :  { %v180_v34 = vmul.f32 %v163_v20, %v152_v30  ;;  %v182_v38 = vmul.f32 %v173_v35, %v154_v31  ;;  %v187_v40 = vsel %vm186_vm2, %v183_v36, 0.0 }
  0xce   :  { %v184_v37 = vadd.f32 %v181_v33, %v180_v34 }
  0xd0   :  { %v185_v39 = vadd.f32 %v184_v37, %v182_v38 }
  0xd2   :  { %v188_v41 = vadd.f32 %v187_v40, %v185_v39 }
  0xd4   :  { %v189_v42 = vrot.slane %v188_v41, 4 }
  0xd6   :  { %v190_v43 = vadd.f32 %v189_v42, %v188_v41 }
  0xd8   :  { %v191_v44 = vrot.slane %v190_v43, 2 }
  0xda   :  { %v192_v45 = vadd.f32 %v191_v44, %v190_v43 }
  0xdc   :  { %v193_v46 = vrot.slane %v192_v45, 1 }
  0xde   :  { %v194_v48 = vadd.f32 %v193_v46, %v192_v45 }
  0xe0   :  { %v197_v49 = vadd.f32 %v196_v47, %v194_v48 }
  0xe2   :  { %198 = vst [vmem:[%s311_s5] sm:$0x1] %v197_v49 }

</bundles_post_ra>
